<compile_context>
chip_gen: v7x
topology: tpu7x:2x2x1
jax: 0.10.0
libtpu: 0.0.40
codegen_flags: <defaults>
</compile_context>

<pallas_src>
import jax
import jax.numpy as jnp
from jax.experimental import pallas as pl
from jax.experimental.pallas import tpu as pltpu

# ---- static problem sizes (small, consistent with the module's forward) ----
B = 2            # batch
CIN = 4          # input channels (stand-in for RGB=3, padded to 4)
H = W = 16       # spatial
CFEAT = 64       # backbone feature channels (stand-in for e.g. resnet18's 512)
NCLS = 8         # n_classes
KH = KW = 3      # conv kernel size

BPAD = 8         # output-slab sublane padding (>= B, multiple of 8)
NPAD = 128       # output-slab lane padding (>= NCLS, multiple of 128)
KCOL = KH * KW * CIN     # im2col contraction dim = 36
M = B * H * W            # matmul M dim = 512


def _model_kernel(patches_ref, wconv_ref, bconv_ref, pool_ref,
                  wfc_ref, bfc_ref, o_ref):
    """Single grid step: whole batch at once.

    patches_ref: (M, KCOL)      im2col patch matrix (built wrapper-side)
    wconv_ref  : (KCOL, CFEAT)  conv weights reshaped to a matrix
    bconv_ref  : (1, CFEAT)     conv bias
    pool_ref   : (BPAD, M)      per-batch average-pool matrix (1/(H*W) entries)
    wfc_ref    : (CFEAT, NPAD)  classifier weight, N zero-padded to 128 lanes
    bfc_ref    : (1, NPAD)      classifier bias, zero-padded
    o_ref      : (BPAD, NPAD)   lane-dense output slab
    """
    # Conv as one im2col matmul (MXU), then bias + ReLU (VPU).
    feat = jnp.maximum(
        jnp.dot(patches_ref[...], wconv_ref[...],
                preferred_element_type=jnp.float32) + bconv_ref[...],
        0.0)                                                  # (M, CFEAT)

    # Global average pool per batch element as an MXU matmul
    # (1/(H*W) scale is folded into pool_ref; padded rows are zero).
    pooled = jnp.dot(pool_ref[...], feat,
                     preferred_element_type=jnp.float32)      # (BPAD, CFEAT)

    # Dropout(p=0.5) in eval mode is identity.  Classifier Linear.
    logits = jnp.dot(pooled, wfc_ref[...],
                     preferred_element_type=jnp.float32) + bfc_ref[...]
    o_ref[...] = logits.astype(o_ref.dtype)                   # (BPAD, NPAD)


def get_model_nm_forward(x_nchw, params):
    """x_nchw: (B, CIN, H, W) float32. Returns (B, NCLS) logits."""
    wconv, bconv, wfc, bfc = params

    # ---- wrapper-side layout plumbing (pure XLA, ~tens of KB) ----
    # NCHW -> NHWC, zero-pad spatial by 1 ('same' 3x3 conv).
    x = jnp.transpose(x_nchw, (0, 2, 3, 1))                   # (B, H, W, CIN)
    xp = jnp.pad(x, ((0, 0), (1, 1), (1, 1), (0, 0)))         # (B, H+2, W+2, CIN)

    # im2col: tap order (kh, kw, c) to match wconv.reshape(KCOL, CFEAT).
    cols = []
    for kh in range(KH):
        for kw in range(KW):
            cols.append(xp[:, kh:kh + H, kw:kw + W, :])       # (B, H, W, CIN)
    patches = jnp.concatenate(cols, axis=-1).reshape(M, KCOL)  # (512, 36)

    wconv_mat = wconv.reshape(KCOL, CFEAT)                    # (36, 64)

    # Per-batch average-pool matrix: rows 0..B-1 select their H*W block with
    # weight 1/(H*W); rows B..BPAD-1 are zero.
    row_ids = jnp.arange(BPAD, dtype=jnp.int32)[:, None]      # (BPAD, 1)
    col_bat = (jnp.arange(M, dtype=jnp.int32) // (H * W))[None, :]
    pool_mat = jnp.where(row_ids == col_bat,
                         jnp.float32(1.0 / (H * W)),
                         jnp.float32(0.0))                    # (BPAD, M)

    # Lane-pad the classifier so the output store is a full (8, 128) slab.
    wfc_p = jnp.pad(wfc, ((0, 0), (0, NPAD - NCLS)))          # (CFEAT, 128)
    bfc_p = jnp.pad(bfc, ((0, 0), (0, NPAD - NCLS)))          # (1, 128)

    grid_spec = pltpu.PrefetchScalarGridSpec(
        num_scalar_prefetch=0,
        grid=(1,),
        in_specs=[
            pl.BlockSpec((M, KCOL), lambda i: (0, 0)),
            pl.BlockSpec((KCOL, CFEAT), lambda i: (0, 0)),
            pl.BlockSpec((1, CFEAT), lambda i: (0, 0)),
            pl.BlockSpec((BPAD, M), lambda i: (0, 0)),
            pl.BlockSpec((CFEAT, NPAD), lambda i: (0, 0)),
            pl.BlockSpec((1, NPAD), lambda i: (0, 0)),
        ],
        out_specs=pl.BlockSpec((BPAD, NPAD), lambda i: (0, 0)),
    )

    out_slab = pl.pallas_call(
        _model_kernel,
        out_shape=jax.ShapeDtypeStruct((BPAD, NPAD), jnp.float32),
        grid_spec=grid_spec,
        compiler_params=pltpu.CompilerParams(
            dimension_semantics=("arbitrary",)),
    )(patches, wconv_mat, bconv, pool_mat, wfc_p, bfc_p)

    return out_slab[:B, :NCLS]


def _reference_forward(x_nchw, params):
    """Pure-JAX reference with identical math for correctness check."""
    wconv, bconv, wfc, bfc = params
    x = jnp.transpose(x_nchw, (0, 2, 3, 1))
    xp = jnp.pad(x, ((0, 0), (1, 1), (1, 1), (0, 0)))
    acc = jnp.zeros((B, H, W, CFEAT), jnp.float32)
    for kh in range(KH):
        for kw in range(KW):
            patch = xp[:, kh:kh + H, kw:kw + W, :]            # (B, H, W, CIN)
            acc = acc + jnp.einsum('bhwc,cf->bhwf', patch, wconv[kh, kw])
    feat = jnp.maximum(acc + bconv[0], 0.0)
    pooled = jnp.mean(feat, axis=(1, 2))                      # (B, CFEAT)
    return pooled @ wfc + bfc[0]


def init_params(key):
    k1, k2, k3 = jax.random.split(key, 3)
    wconv = jax.random.normal(k1, (KH, KW, CIN, CFEAT), jnp.float32) * 0.1
    bconv = jnp.zeros((1, CFEAT), jnp.float32)
    wfc = jax.random.normal(k2, (CFEAT, NCLS), jnp.float32) * 0.05
    bfc = jax.random.normal(k3, (1, NCLS), jnp.float32) * 0.01
    return wconv, bconv, wfc, bfc


if __name__ == "__main__":
    key = jax.random.PRNGKey(0)
    kx, kp = jax.random.split(key)
    x = jax.random.normal(kx, (B, CIN, H, W), jnp.float32)
    params = init_params(kp)

    out = get_model_nm_forward(x, params)
    out = jax.block_until_ready(out)

    ref = _reference_forward(x, params)
    assert out.shape == (B, NCLS)
    assert jnp.allclose(out, ref, atol=1e-4, rtol=1e-4), "mismatch vs reference"

    print("KERNEL_OK")
</pallas_src>

<mosaic_0001>
module attributes {stable_mosaic.version = 11 : i64} {
  func.func @_model_kernel(%arg0: i32, %arg1: memref<512x36xf32, #tpu.memory_space<vmem>>, %arg2: memref<36x64xf32, #tpu.memory_space<vmem>>, %arg3: memref<1x64xf32, #tpu.memory_space<vmem>>, %arg4: memref<8x512xf32, #tpu.memory_space<vmem>>, %arg5: memref<64x128xf32, #tpu.memory_space<vmem>>, %arg6: memref<1x128xf32, #tpu.memory_space<vmem>>, %arg7: memref<8x128xf32, #tpu.memory_space<vmem>>) attributes {dimension_semantics = [#tpu.dimension_semantics<arbitrary>], iteration_bounds = array<i64: 1>, scalar_prefetch = 0 : i64, scratch_operands = 0 : i64, tpu.core_type = #tpu.core_type<tc>, window_params = [{pipeline_mode = #tpu.pipeline_mode<synchronous>, transform_indices = @transform_0, window_bounds = array<i64: 512, 36>}, {pipeline_mode = #tpu.pipeline_mode<synchronous>, transform_indices = @transform_1, window_bounds = array<i64: 36, 64>}, {pipeline_mode = #tpu.pipeline_mode<synchronous>, transform_indices = @transform_2, window_bounds = array<i64: 1, 64>}, {pipeline_mode = #tpu.pipeline_mode<synchronous>, transform_indices = @transform_3, window_bounds = array<i64: 8, 512>}, {pipeline_mode = #tpu.pipeline_mode<synchronous>, transform_indices = @transform_4, window_bounds = array<i64: 64, 128>}, {pipeline_mode = #tpu.pipeline_mode<synchronous>, transform_indices = @transform_5, window_bounds = array<i64: 1, 128>}, {pipeline_mode = #tpu.pipeline_mode<synchronous>, transform_indices = @transform_6, window_bounds = array<i64: 8, 128>}]} {
    %c0 = arith.constant 0 : index
    %c0_0 = arith.constant 0 : index
    %0 = vector.load %arg1[%c0, %c0_0] : memref<512x36xf32, #tpu.memory_space<vmem>>, vector<512x36xf32>
    %c0_1 = arith.constant 0 : index
    %c0_2 = arith.constant 0 : index
    %1 = vector.load %arg2[%c0_1, %c0_2] : memref<36x64xf32, #tpu.memory_space<vmem>>, vector<36x64xf32>
    %cst = arith.constant dense<0.000000e+00> : vector<512x64xf32>
    %2 = tpu.matmul %0, %1, %cst {dimension_numbers = #tpu.dot_dimension_numbers<[1], [0], [0], [1], [0, 0, 1, 1], [], []>} : vector<512x36xf32>, vector<36x64xf32>, vector<512x64xf32> -> vector<512x64xf32>
    %c0_3 = arith.constant 0 : index
    %c0_4 = arith.constant 0 : index
    %3 = vector.load %arg3[%c0_3, %c0_4] : memref<1x64xf32, #tpu.memory_space<vmem>>, vector<1x64xf32>
    %4 = vector.broadcast %3 : vector<1x64xf32> to vector<512x64xf32>
    %5 = arith.addf %2, %4 : vector<512x64xf32>
    %cst_5 = arith.constant 0.000000e+00 : f32
    %6 = vector.broadcast %cst_5 : f32 to vector<512x64xf32>
    %7 = arith.maximumf %5, %6 : vector<512x64xf32>
    %c0_6 = arith.constant 0 : index
    %c0_7 = arith.constant 0 : index
    %8 = vector.load %arg4[%c0_6, %c0_7] : memref<8x512xf32, #tpu.memory_space<vmem>>, vector<8x512xf32>
    %cst_8 = arith.constant dense<0.000000e+00> : vector<8x64xf32>
    %9 = tpu.matmul %8, %7, %cst_8 {dimension_numbers = #tpu.dot_dimension_numbers<[1], [0], [0], [1], [0, 0, 1, 1], [], []>} : vector<8x512xf32>, vector<512x64xf32>, vector<8x64xf32> -> vector<8x64xf32>
    %c0_9 = arith.constant 0 : index
    %c0_10 = arith.constant 0 : index
    %10 = vector.load %arg5[%c0_9, %c0_10] : memref<64x128xf32, #tpu.memory_space<vmem>>, vector<64x128xf32>
    %cst_11 = arith.constant dense<0.000000e+00> : vector<8x128xf32>
    %11 = tpu.matmul %9, %10, %cst_11 {dimension_numbers = #tpu.dot_dimension_numbers<[1], [0], [0], [1], [0, 0, 1, 1], [], []>} : vector<8x64xf32>, vector<64x128xf32>, vector<8x128xf32> -> vector<8x128xf32>
    %c0_12 = arith.constant 0 : index
    %c0_13 = arith.constant 0 : index
    %12 = vector.load %arg6[%c0_12, %c0_13] : memref<1x128xf32, #tpu.memory_space<vmem>>, vector<1x128xf32>
    %13 = vector.broadcast %12 : vector<1x128xf32> to vector<8x128xf32>
    %14 = arith.addf %11, %13 : vector<8x128xf32>
    %c0_14 = arith.constant 0 : index
    %c0_15 = arith.constant 0 : index
    %15 = vector.load %arg7[%c0_14, %c0_15] : memref<8x128xf32, #tpu.memory_space<vmem>>, vector<8x128xf32>
    tpu.vector_store %arg7[%c0_14, %c0_15], %14 {strides = array<i32>} : memref<8x128xf32, #tpu.memory_space<vmem>>, vector<8x128xf32>,
    return
  }
  func.func @transform_0(%arg0: i32) -> (i32, i32) {
    %c0_i32 = arith.constant 0 : i32
    %c0_i32_0 = arith.constant 0 : i32
    %c0_i32_1 = arith.constant 0 : i32
    return %c0_i32, %c0_i32_0 : i32, i32
  }
  func.func @transform_1(%arg0: i32) -> (i32, i32) {
    %c0_i32 = arith.constant 0 : i32
    %c0_i32_0 = arith.constant 0 : i32
    %c0_i32_1 = arith.constant 0 : i32
    return %c0_i32, %c0_i32_0 : i32, i32
  }
  func.func @transform_2(%arg0: i32) -> (i32, i32) {
    %c0_i32 = arith.constant 0 : i32
    %c0_i32_0 = arith.constant 0 : i32
    %c0_i32_1 = arith.constant 0 : i32
    return %c0_i32, %c0_i32_0 : i32, i32
  }
  func.func @transform_3(%arg0: i32) -> (i32, i32) {
    %c0_i32 = arith.constant 0 : i32
    %c0_i32_0 = arith.constant 0 : i32
    %c0_i32_1 = arith.constant 0 : i32
    return %c0_i32, %c0_i32_0 : i32, i32
  }
  func.func @transform_4(%arg0: i32) -> (i32, i32) {
    %c0_i32 = arith.constant 0 : i32
    %c0_i32_0 = arith.constant 0 : i32
    %c0_i32_1 = arith.constant 0 : i32
    return %c0_i32, %c0_i32_0 : i32, i32
  }
  func.func @transform_5(%arg0: i32) -> (i32, i32) {
    %c0_i32 = arith.constant 0 : i32
    %c0_i32_0 = arith.constant 0 : i32
    %c0_i32_1 = arith.constant 0 : i32
    return %c0_i32, %c0_i32_0 : i32, i32
  }
  func.func @transform_6(%arg0: i32) -> (i32, i32) {
    %c0_i32 = arith.constant 0 : i32
    %c0_i32_0 = arith.constant 0 : i32
    %c0_i32_1 = arith.constant 0 : i32
    return %c0_i32, %c0_i32_0 : i32, i32
  }
}

</mosaic_0001>

<bundles_post_ra>
// kernel: tpu_custom_call.1
= control target key start
LH: loop header
LB: loop body
LE: loop exit
PB: predicated region body
PF: predicated region fallthrough
CT: control target
= control target key end

     0   :  { %vm100_vm0 = vcmask 293888   ;;  %vm293_vm1 = vcmask 1043456   ;;  %s1934_s0 = inlined_call_operand.vmem [shape: f32[512,36], index: 0, kind: input, shape index: {}]   ;;  %s1935_s1 = inlined_call_operand.vmem [shape: f32[36,64], index: 1, kind: input, shape index: {}]   ;;  %s1936_s2 = inlined_call_operand.vmem [shape: f32[1,64], index: 2, kind: input, shape index: {}]   ;;  %s1937_s3 = inlined_call_operand.vmem [shape: f32[8,512], index: 3, kind: input, shape index: {}]   ;;  %s1938_s4 = inlined_call_operand.vmem [shape: f32[64,128], index: 4, kind: input, shape index: {}]   ;;  %s1939_s5 = inlined_call_operand.vmem [shape: f32[1,128], index: 5, kind: input, shape index: {}]   ;;  %s1940_s6 = inlined_call_operand.hbm [shape: f32[8,128], index: 6, kind: output, shape index: {}]  }
   0x1   :  { %v88_v0 = vld [vmem:[%s1935_s1] sm:$0xff]  ;;  %v89_v1 = vld [vmem:[%s1935_s1 + $0x8] sm:$0xff]  ;;  %v90_v2 = vld [vmem:[%s1935_s1 + $0x10] sm:$0xff] }
   0x2   :  { %v1335_v3 = vpack.c.bf16 %v89_v1, %v88_v0  ;;  %v91_v4 = vld [vmem:[%s1935_s1 + $0x18] sm:$0xff]  ;;  %v24_v5 = vld [vmem:[%s1934_s0] sm:$0xff]  ;;  %v25_v8 = vld [vmem:[%s1934_s0 + $0x8] sm:$0xff] }
   0x3   :  { %v1339_v6 = vpack.c.bf16 %v91_v4, %v90_v2  ;;  %1220 = vmatprep.mubr.msk.f32.mxu0 %vm100_vm0, %v24_v5  ;;  %v92_v7 = vld [vmem:[%s1935_s1 + $0x20] sm:$0xf]  ;;  %v26_v9 = vld [vmem:[%s1934_s0 + $0x10] sm:$0xff]  ;;  %v71_v11 = vld [vmem:[%s1934_s0 + $0x178] sm:$0xff] }
   0x4   :  { %1336 = vmatprep.subr.bf16.mxu0 %v1335_v3  ;;  %1419 = vmatprep.subr.bf16.mxu1 %v1335_v3  ;;  %v70_v10 = vld [vmem:[%s1934_s0 + $0x170] sm:$0xff]  ;;  %v72_v12 = vld [vmem:[%s1934_s0 + $0x180] sm:$0xff]  ;;  %v27_v13 = vld [vmem:[%s1934_s0 + $0x18] sm:$0xff] }
   0x5   :  { %1338 = vmatpush3.bf16.msra.mxu0 %v1335_v3  ;;  %1422 = vmatpush3.bf16.msra.mxu1 %v1335_v3  ;;  %v28_v14 = vld [vmem:[%s1934_s0 + $0x20] sm:$0xff]  ;;  %v73_v15 = vld [vmem:[%s1934_s0 + $0x188] sm:$0xff]  ;;  %v74_v16 = vld [vmem:[%s1934_s0 + $0x190] sm:$0xff] }
   0x6   :  { %1340 = vmatprep.subr.bf16.mxu0 %v1339_v6  ;;  %1420 = vmatprep.subr.bf16.mxu1 %v1339_v6  ;;  %v29_v17 = vld [vmem:[%s1934_s0 + $0x28] sm:$0xff]  ;;  %v30_v18 = vld [vmem:[%s1934_s0 + $0x30] sm:$0xff]  ;;  %v75_v19 = vld [vmem:[%s1934_s0 + $0x198] sm:$0xff] }
   0x7   :  { %1289 = vmatprep.mubr.msk.f32.mxu1 %vm100_vm0, %v70_v10  ;;  %v76_v20 = vld [vmem:[%s1934_s0 + $0x1a0] sm:$0xff]  ;;  %v31_v21 = vld [vmem:[%s1934_s0 + $0x38] sm:$0xff]  ;;  %v77_v23 = vld [vmem:[%s1934_s0 + $0x1a8] sm:$0xff] }
   0x8   :  { %v32_v22 = vld [vmem:[%s1934_s0 + $0x40] sm:$0xff] }
   0x9   :  { %1342 = vmatpush3.bf16.msra.mxu0 %v1339_v6  ;;  %1423 = vmatpush3.bf16.msra.mxu1 %v1339_v6 }
   0xa   :  { %1218 = vmatprep.subr.msk.mxu0 %vm293_vm1, %v92_v7  ;;  %1421 = vmatprep.subr.msk.mxu1 %vm293_vm1, %v92_v7 }
   0xd   :  { %1219 = vmatpush3.msk.msra.mxu0 %vm293_vm1, %v92_v7  ;;  %1424 = vmatpush3.msk.msra.mxu1 %vm293_vm1, %v92_v7 }
   0xe   :  { %1221 = vmatmul.mubr.msk.f32.vlgmr.msra.gmra.mrb[0].mxu0 %vm100_vm0, %v25_v8  ;;  %1290 = vmatmul.mubr.msk.f32.vlgmr.msra.gmra.mrb[0].mxu1 %vm100_vm0, %v71_v11 }
   0xf   :  { %1223 = vmatprep.mubr.msk.f32.mxu0 %vm100_vm0, %v26_v9  ;;  %1292 = vmatprep.mubr.msk.f32.mxu1 %vm100_vm0, %v72_v12 }
  0x12   :  { %1224 = vmatmul.mubr.msk.f32.gmra.mrb[2].mxu0 %vm100_vm0, %v27_v13  ;;  %1293 = vmatmul.mubr.msk.f32.gmra.mrb[2].mxu1 %vm100_vm0, %v73_v15 }
  0x13   :  { %1226 = vmatprep.mubr.msk.f32.mxu0 %vm100_vm0, %v28_v14  ;;  %1295 = vmatprep.mubr.msk.f32.mxu1 %vm100_vm0, %v74_v16 }
  0x16   :  { %1227 = vmatmul.mubr.msk.f32.gmra.mrb[4].mxu0 %vm100_vm0, %v29_v17  ;;  %1296 = vmatmul.mubr.msk.f32.gmra.mrb[4].mxu1 %vm100_vm0, %v75_v19 }
  0x17   :  { %1229 = vmatprep.mubr.msk.f32.mxu0 %vm100_vm0, %v30_v18  ;;  %1298 = vmatprep.mubr.msk.f32.mxu1 %vm100_vm0, %v76_v20 }
  0x18   :  { %11 = vsyncpa [#allocation3], 0  ;;  %v78_v24 = vld [vmem:[%s1934_s0 + $0x1b0] sm:$0xff]  ;;  %v33_v25 = vld [vmem:[%s1934_s0 + $0x48] sm:$0xff]  ;;  %vm1454_vm2 = vmmov 0   ;;  %vm905_vm3 = vcmask 523264  }
  0x19   :  { %v34_v26 = vld [vmem:[%s1934_s0 + $0x50] sm:$0xff]  ;;  %v79_v27 = vld [vmem:[%s1934_s0 + $0x1b8] sm:$0xff]  ;;  %v80_v28 = vld [vmem:[%s1934_s0 + $0x1c0] sm:$0xff]  ;;  %s1456_s10 = smov [#allocation2]  }
  0x1a   :  { %1230 = vmatmul.mubr.msk.f32.gmra.mrb[6].mxu0 %vm100_vm0, %v31_v21  ;;  %1299 = vmatmul.mubr.msk.f32.gmra.mrb[6].mxu1 %vm100_vm0, %v77_v23  ;;  %v35_v29 = vld [vmem:[%s1934_s0 + $0x58] sm:$0xff]  ;;  %v36_v30 = vld [vmem:[%s1934_s0 + $0x60] sm:$0xff]  ;;  %v81_v31 = vld [vmem:[%s1934_s0 + $0x1c8] sm:$0xff] }
  0x1b   :  { %1232 = vmatprep.mubr.msk.f32.mxu0 %vm100_vm0, %v32_v22  ;;  %1301 = vmatprep.mubr.msk.f32.mxu1 %vm100_vm0, %v78_v24  ;;  %v82_v32 = vld [vmem:[%s1934_s0 + $0x1d0] sm:$0xff]  ;;  %v37_v33 = vld [vmem:[%s1934_s0 + $0x68] sm:$0xff]  ;;  %v83_v35 = vld [vmem:[%s1934_s0 + $0x1d8] sm:$0xff] }
  0x1c   :  { %v38_v34 = vld [vmem:[%s1934_s0 + $0x70] sm:$0xff]  ;;  %v84_v36 = vld [vmem:[%s1934_s0 + $0x1e0] sm:$0xff]  ;;  %v39_v37 = vld [vmem:[%s1934_s0 + $0x78] sm:$0xff] }
  0x1d   :  { %v40_v38 = vld [vmem:[%s1934_s0 + $0x80] sm:$0xff]  ;;  %v85_v39 = vld [vmem:[%s1934_s0 + $0x1e8] sm:$0xff]  ;;  %v86_v40 = vld [vmem:[%s1934_s0 + $0x1f0] sm:$0xff] }
  0x1e   :  { %1233 = vmatmul.mubr.msk.f32.gmra.mrb[8].mxu0 %vm100_vm0, %v33_v25  ;;  %1302 = vmatmul.mubr.msk.f32.gmra.mrb[8].mxu1 %vm100_vm0, %v79_v27  ;;  %v41_v41 = vld [vmem:[%s1934_s0 + $0x88] sm:$0xff]  ;;  %v42_v42 = vld [vmem:[%s1934_s0 + $0x90] sm:$0xff]  ;;  %v87_v43 = vld [vmem:[%s1934_s0 + $0x1f8] sm:$0xff] }
  0x1f   :  { %1235 = vmatprep.mubr.msk.f32.mxu0 %vm100_vm0, %v34_v26  ;;  %1304 = vmatprep.mubr.msk.f32.mxu1 %vm100_vm0, %v80_v28  ;;  %v43_v44 = vld [vmem:[%s1934_s0 + $0x98] sm:$0xff]  ;;  %v44_v45 = vld [vmem:[%s1934_s0 + $0xa0] sm:$0xff]  ;;  %v45_v46 = vld [vmem:[%s1934_s0 + $0xa8] sm:$0xff] }
  0x20   :  { %v46_v47 = vld [vmem:[%s1934_s0 + $0xb0] sm:$0xff]  ;;  %v47_v48 = vld [vmem:[%s1934_s0 + $0xb8] sm:$0xff]  ;;  %v48_v49 = vld [vmem:[%s1934_s0 + $0xc0] sm:$0xff] }
  0x21   :  { %v49_v50 = vld [vmem:[%s1934_s0 + $0xc8] sm:$0xff]  ;;  %v50_v51 = vld [vmem:[%s1934_s0 + $0xd0] sm:$0xff]  ;;  %v51_v52 = vld [vmem:[%s1934_s0 + $0xd8] sm:$0xff] }
  0x22   :  { %1236 = vmatmul.mubr.msk.f32.gmra.mrb[10].mxu0 %vm100_vm0, %v35_v29  ;;  %1305 = vmatmul.mubr.msk.f32.gmra.mrb[10].mxu1 %vm100_vm0, %v81_v31  ;;  %v52_v53 = vld [vmem:[%s1934_s0 + $0xe0] sm:$0xff]  ;;  %v53_v54 = vld [vmem:[%s1934_s0 + $0xe8] sm:$0xff]  ;;  %v54_v55 = vld [vmem:[%s1934_s0 + $0xf0] sm:$0xff] }
  0x23   :  { %1238 = vmatprep.mubr.msk.f32.mxu0 %vm100_vm0, %v36_v30  ;;  %1307 = vmatprep.mubr.msk.f32.mxu1 %vm100_vm0, %v82_v32  ;;  %v55_v56 = vld [vmem:[%s1934_s0 + $0xf8] sm:$0xff]  ;;  %v56_v57 = vld [vmem:[%s1934_s0 + $0x100] sm:$0xff]  ;;  %v57_v58 = vld [vmem:[%s1934_s0 + $0x108] sm:$0xff] }
  0x24   :  { %v58_v59 = vld [vmem:[%s1934_s0 + $0x110] sm:$0xff]  ;;  %v59_v60 = vld [vmem:[%s1934_s0 + $0x118] sm:$0xff]  ;;  %v60_v61 = vld [vmem:[%s1934_s0 + $0x120] sm:$0xff] }
  0x25   :  { %v61_v62 = vld [vmem:[%s1934_s0 + $0x128] sm:$0xff]  ;;  %v62_v63 = vld [vmem:[%s1934_s0 + $0x130] sm:$0xff]  ;;  %v63_v0 = vld [vmem:[%s1934_s0 + $0x138] sm:$0xff] }
  0x26   :  { %1239 = vmatmul.mubr.msk.f32.gmra.mrb[12].mxu0 %vm100_vm0, %v37_v33  ;;  %1308 = vmatmul.mubr.msk.f32.gmra.mrb[12].mxu1 %vm100_vm0, %v83_v35  ;;  %v64_v1 = vld [vmem:[%s1934_s0 + $0x140] sm:$0xff]  ;;  %v65_v2 = vld [vmem:[%s1934_s0 + $0x148] sm:$0xff]  ;;  %v66_v3 = vld [vmem:[%s1934_s0 + $0x150] sm:$0xff] }
  0x27   :  { %1241 = vmatprep.mubr.msk.f32.mxu0 %vm100_vm0, %v38_v34  ;;  %1310 = vmatprep.mubr.msk.f32.mxu1 %vm100_vm0, %v84_v36  ;;  %v67_v4 = vld [vmem:[%s1934_s0 + $0x158] sm:$0xff]  ;;  %v68_v5 = vld [vmem:[%s1934_s0 + $0x160] sm:$0xff]  ;;  %v69_v6 = vld [vmem:[%s1934_s0 + $0x168] sm:$0xff] }
  0x28   :  { %v747_v7 = vld [vmem:[%s1937_s3 + $0x8] sm:$0xff]  ;;  %v1769_v8 = vld [vmem:[%s1936_s2] ss:$0 sm:$0xff] }
  0x2a   :  { %1242 = vmatmul.mubr.msk.f32.gmra.mrb[14].mxu0 %vm100_vm0, %v39_v37  ;;  %1311 = vmatmul.mubr.msk.f32.gmra.mrb[14].mxu1 %vm100_vm0, %v85_v39 }
  0x2b   :  { %1244 = vmatprep.mubr.msk.f32.mxu0 %vm100_vm0, %v40_v38  ;;  %1313 = vmatprep.mubr.msk.f32.mxu1 %vm100_vm0, %v86_v40 }
  0x2e   :  { %1245 = vmatmul.mubr.msk.f32.gmra.mrb[16].mxu0 %vm100_vm0, %v41_v41  ;;  %1314 = vmatmul.mubr.msk.f32.gmra.mrb[16].mxu1 %vm100_vm0, %v87_v43 }
  0x2f   :  { %1247 = vmatprep.mubr.msk.f32.mxu0 %vm100_vm0, %v42_v42  ;;  %814 = vmatprep.mubr.f32.mxu1 %v747_v7 }
  0x32   :  { %1248 = vmatmul.mubr.msk.f32.gmra.mrb[18].mxu0 %vm100_vm0, %v43_v44 }
  0x33   :  { %1250 = vmatprep.mubr.msk.f32.mxu0 %vm100_vm0, %v44_v45 }
  0x36   :  { %1251 = vmatmul.mubr.msk.f32.gmra.mrb[20].mxu0 %vm100_vm0, %v45_v46 }
  0x37   :  { %1253 = vmatprep.mubr.msk.f32.mxu0 %vm100_vm0, %v46_v47 }
  0x3a   :  { %1254 = vmatmul.mubr.msk.f32.gmra.mrb[22].mxu0 %vm100_vm0, %v47_v48 }
  0x3b   :  { %1256 = vmatprep.mubr.msk.f32.mxu0 %vm100_vm0, %v48_v49 }
  0x3e   :  { %1257 = vmatmul.mubr.msk.f32.gmra.mrb[24].mxu0 %vm100_vm0, %v49_v50 }
  0x3f   :  { %1259 = vmatprep.mubr.msk.f32.mxu0 %vm100_vm0, %v50_v51 }
  0x42   :  { %1260 = vmatmul.mubr.msk.f32.gmra.mrb[26].mxu0 %vm100_vm0, %v51_v52 }
  0x43   :  { %1262 = vmatprep.mubr.msk.f32.mxu0 %vm100_vm0, %v52_v53 }
  0x46   :  { %1263 = vmatmul.mubr.msk.f32.gmra.mrb[28].mxu0 %vm100_vm0, %v53_v54 }
  0x47   :  { %1265 = vmatprep.mubr.msk.f32.mxu0 %vm100_vm0, %v54_v55 }
  0x4a   :  { %1266 = vmatmul.mubr.msk.f32.gmra.mrb[30].mxu0 %vm100_vm0, %v55_v56 }
  0x4b   :  { %1268 = vmatprep.mubr.msk.f32.mxu0 %vm100_vm0, %v56_v57 }
  0x4e   :  { %1269 = vmatmul.mubr.msk.f32.gmra.mrb[32].mxu0 %vm100_vm0, %v57_v58 }
  0x4f   :  { %1271 = vmatprep.mubr.msk.f32.mxu0 %vm100_vm0, %v58_v59 }
  0x52   :  { %1272 = vmatmul.mubr.msk.f32.gmra.mrb[34].mxu0 %vm100_vm0, %v59_v60 }
  0x53   :  { %1274 = vmatprep.mubr.msk.f32.mxu0 %vm100_vm0, %v60_v61 }
  0x56   :  { %1275 = vmatmul.mubr.msk.f32.gmra.mrb[36].mxu0 %vm100_vm0, %v61_v62 }
  0x57   :  { %1277 = vmatprep.mubr.msk.f32.mxu0 %vm100_vm0, %v62_v63 }
  0x5a   :  { %1278 = vmatmul.mubr.msk.f32.gmra.mrb[38].mxu0 %vm100_vm0, %v63_v0 }
  0x5b   :  { %1280 = vmatprep.mubr.msk.f32.mxu0 %vm100_vm0, %v64_v1 }
  0x5e   :  { %1281 = vmatmul.mubr.msk.f32.gmra.mrb[40].mxu0 %vm100_vm0, %v65_v2 }
  0x5f   :  { %1283 = vmatprep.mubr.msk.f32.mxu0 %vm100_vm0, %v66_v3 }
  0x62   :  { %1284 = vmatmul.mubr.msk.f32.gmra.mrb[42].mxu0 %vm100_vm0, %v67_v4 }
  0x63   :  { %1286 = vmatprep.mubr.msk.f32.mxu0 %vm100_vm0, %v68_v5 }
  0x66   :  { %1287 = vmatmul.mubr.msk.f32.gmra.mrb[44].mxu0 %vm100_vm0, %v69_v6 }
  0xe1   :  { %v1222_v9 = vpop.f32.mrb[0].mxu0  ;;  %v1291_v12 = vpop.f32.mrb[0].mxu1 }
  0xe2   :  { %v369_v10 = vadd.f32 %v1222_v9, %v1769_v8  ;;  %v363_v11 = vpop.f32.mrb[1].mxu0  ;;  %v599_v14 = vadd.f32 %v1291_v12, %v1769_v8  ;;  %v593_v15 = vpop.f32.mrb[1].mxu1 }
  0xe3   :  { %v364_v13 = vadd.f32 %v1769_v8, %v363_v11  ;;  %v594_v17 = vadd.f32 %v1769_v8, %v593_v15 }
  0xe4   :  { %v683_v16 = vmax.f32 %v369_v10, 0.0  ;;  %v729_v20 = vmax.f32 %v599_v14, 0.0 }
  0xe5   :  { %v682_v18 = vmax.f32 %v364_v13, 0.0  ;;  %v1225_v19 = vpop.f32.mrb[2].mxu0  ;;  %v728_v23 = vmax.f32 %v594_v17, 0.0  ;;  %v1294_v24 = vpop.f32.mrb[2].mxu1 }
  0xe6   :  { %v379_v21 = vadd.f32 %v1225_v19, %v1769_v8  ;;  %v373_v22 = vpop.f32.mrb[3].mxu0  ;;  %v609_v27 = vadd.f32 %v1294_v24, %v1769_v8  ;;  %v603_v28 = vpop.f32.mrb[3].mxu1 }
  0xe7   :  { %v1776_v25 = vpack.c.bf16 %v683_v16, %v682_v18  ;;  %v374_v26 = vadd.f32 %v1769_v8, %v373_v22  ;;  %v1780_v30 = vpack.c.bf16 %v729_v20, %v728_v23  ;;  %v604_v31 = vadd.f32 %v1769_v8, %v603_v28 }
  0xe8   :  { %v685_v29 = vmax.f32 %v379_v21, 0.0  ;;  %v731_v34 = vmax.f32 %v609_v27, 0.0 }
  0xe9   :  { %v684_v32 = vmax.f32 %v374_v26, 0.0  ;;  %v1228_v33 = vpop.f32.mrb[4].mxu0  ;;  %v730_v37 = vmax.f32 %v604_v31, 0.0  ;;  %v1297_v38 = vpop.f32.mrb[4].mxu1 }
  0xea   :  { %v389_v35 = vadd.f32 %v1228_v33, %v1769_v8  ;;  %v383_v36 = vpop.f32.mrb[5].mxu0  ;;  %v619_v41 = vadd.f32 %v1297_v38, %v1769_v8  ;;  %v613_v42 = vpop.f32.mrb[5].mxu1 }
  0xeb   :  { %v1784_v39 = vpack.c.bf16 %v685_v29, %v684_v32  ;;  %v384_v40 = vadd.f32 %v1769_v8, %v383_v36  ;;  %v1788_v44 = vpack.c.bf16 %v731_v34, %v730_v37  ;;  %v614_v45 = vadd.f32 %v1769_v8, %v613_v42 }
  0xec   :  { %v687_v43 = vmax.f32 %v389_v35, 0.0  ;;  %v733_v48 = vmax.f32 %v619_v41, 0.0 }
  0xed   :  { %v686_v46 = vmax.f32 %v384_v40, 0.0  ;;  %v1231_v47 = vpop.f32.mrb[6].mxu0  ;;  %v732_v51 = vmax.f32 %v614_v45, 0.0  ;;  %v1300_v52 = vpop.f32.mrb[6].mxu1 }
  0xee   :  { %v399_v49 = vadd.f32 %v1231_v47, %v1769_v8  ;;  %v393_v50 = vpop.f32.mrb[7].mxu0  ;;  %v629_v55 = vadd.f32 %v1300_v52, %v1769_v8  ;;  %v623_v56 = vpop.f32.mrb[7].mxu1 }
  0xef   :  { %v1792_v53 = vpack.c.bf16 %v687_v43, %v686_v46  ;;  %v394_v54 = vadd.f32 %v1769_v8, %v393_v50  ;;  %v1796_v58 = vpack.c.bf16 %v733_v48, %v732_v51  ;;  %v624_v59 = vadd.f32 %v1769_v8, %v623_v56 }
  0xf0   :  { %v689_v57 = vmax.f32 %v399_v49, 0.0  ;;  %v735_v62 = vmax.f32 %v629_v55, 0.0 }
  0xf1   :  { %v688_v60 = vmax.f32 %v394_v54, 0.0  ;;  %v1234_v61 = vpop.f32.mrb[8].mxu0  ;;  %v734_v1 = vmax.f32 %v624_v59, 0.0  ;;  %v1303_v2 = vpop.f32.mrb[8].mxu1 }
  0xf2   :  { %v409_v63 = vadd.f32 %v1234_v61, %v1769_v8  ;;  %v403_v0 = vpop.f32.mrb[9].mxu0  ;;  %v639_v5 = vadd.f32 %v1303_v2, %v1769_v8  ;;  %v633_v6 = vpop.f32.mrb[9].mxu1 }
  0xf3   :  { %v1800_v3 = vpack.c.bf16 %v689_v57, %v688_v60  ;;  %v404_v4 = vadd.f32 %v1769_v8, %v403_v0  ;;  %v1804_v9 = vpack.c.bf16 %v735_v62, %v734_v1  ;;  %v634_v10 = vadd.f32 %v1769_v8, %v633_v6 }
  0xf4   :  { %v691_v7 = vmax.f32 %v409_v63, 0.0  ;;  %v737_v13 = vmax.f32 %v639_v5, 0.0 }
  0xf5   :  { %v690_v11 = vmax.f32 %v404_v4, 0.0  ;;  %v1237_v12 = vpop.f32.mrb[10].mxu0  ;;  %v736_v16 = vmax.f32 %v634_v10, 0.0  ;;  %v1306_v17 = vpop.f32.mrb[10].mxu1 }
  0xf6   :  { %v419_v14 = vadd.f32 %v1237_v12, %v1769_v8  ;;  %v413_v15 = vpop.f32.mrb[11].mxu0  ;;  %v649_v20 = vadd.f32 %v1306_v17, %v1769_v8  ;;  %v643_v21 = vpop.f32.mrb[11].mxu1 }
  0xf7   :  { %v1808_v18 = vpack.c.bf16 %v691_v7, %v690_v11  ;;  %v414_v19 = vadd.f32 %v1769_v8, %v413_v15  ;;  %v1812_v23 = vpack.c.bf16 %v737_v13, %v736_v16  ;;  %v644_v24 = vadd.f32 %v1769_v8, %v643_v21 }
  0xf8   :  { %v693_v22 = vmax.f32 %v419_v14, 0.0  ;;  %v739_v28 = vmax.f32 %v649_v20, 0.0 }
  0xf9   :  { %v692_v26 = vmax.f32 %v414_v19, 0.0  ;;  %v1240_v27 = vpop.f32.mrb[12].mxu0  ;;  %v738_v32 = vmax.f32 %v644_v24, 0.0  ;;  %v1309_v33 = vpop.f32.mrb[12].mxu1 }
  0xfa   :  { %v429_v29 = vadd.f32 %v1240_v27, %v1769_v8  ;;  %v423_v31 = vpop.f32.mrb[13].mxu0  ;;  %v659_v36 = vadd.f32 %v1309_v33, %v1769_v8  ;;  %v653_v37 = vpop.f32.mrb[13].mxu1 }
  0xfb   :  { %v1816_v34 = vpack.c.bf16 %v693_v22, %v692_v26  ;;  %v424_v35 = vadd.f32 %v1769_v8, %v423_v31  ;;  %v1820_v40 = vpack.c.bf16 %v739_v28, %v738_v32  ;;  %v654_v41 = vadd.f32 %v1769_v8, %v653_v37 }
  0xfc   :  { %v695_v38 = vmax.f32 %v429_v29, 0.0  ;;  %v741_v45 = vmax.f32 %v659_v36, 0.0 }
  0xfd   :  { %v694_v42 = vmax.f32 %v424_v35, 0.0  ;;  %v1243_v43 = vpop.f32.mrb[14].mxu0  ;;  %v740_v48 = vmax.f32 %v654_v41, 0.0  ;;  %v1312_v49 = vpop.f32.mrb[14].mxu1 }
  0xfe   :  { %v439_v46 = vadd.f32 %v1243_v43, %v1769_v8  ;;  %v433_v47 = vpop.f32.mrb[15].mxu0  ;;  %v669_v52 = vadd.f32 %v1312_v49, %v1769_v8  ;;  %v663_v54 = vpop.f32.mrb[15].mxu1 }
  0xff   :  { %v1824_v50 = vpack.c.bf16 %v695_v38, %v694_v42  ;;  %v434_v51 = vadd.f32 %v1769_v8, %v433_v47  ;;  %v1828_v56 = vpack.c.bf16 %v741_v45, %v740_v48  ;;  %v664_v57 = vadd.f32 %v1769_v8, %v663_v54 }
 0x100   :  { %v697_v55 = vmax.f32 %v439_v46, 0.0  ;;  %v743_v61 = vmax.f32 %v669_v52, 0.0 }
 0x101   :  { %v696_v59 = vmax.f32 %v434_v51, 0.0  ;;  %v1246_v60 = vpop.f32.mrb[16].mxu0  ;;  %v742_v0 = vmax.f32 %v664_v57, 0.0  ;;  %v1315_v1 = vpop.f32.mrb[16].mxu1 }
 0x102   :  { %v449_v62 = vadd.f32 %v1246_v60, %v1769_v8  ;;  %v443_v63 = vpop.f32.mrb[17].mxu0  ;;  %v679_v5 = vadd.f32 %v1315_v1, %v1769_v8  ;;  %v673_v6 = vpop.f32.mrb[17].mxu1 }
 0x103   :  { %v1832_v2 = vpack.c.bf16 %v697_v55, %v696_v59  ;;  %v444_v4 = vadd.f32 %v1769_v8, %v443_v63  ;;  %v1836_v10 = vpack.c.bf16 %v743_v61, %v742_v0  ;;  %v674_v11 = vadd.f32 %v1769_v8, %v673_v6 }
 0x104   :  { %v699_v7 = vmax.f32 %v449_v62, 0.0  ;;  %v745_v14 = vmax.f32 %v679_v5, 0.0 }
 0x105   :  { %v698_v12 = vmax.f32 %v444_v4, 0.0  ;;  %v1249_v13 = vpop.f32.mrb[18].mxu0  ;;  %v744_v17 = vmax.f32 %v674_v11, 0.0 }
 0x106   :  { %v459_v15 = vadd.f32 %v1249_v13, %v1769_v8  ;;  %v453_v16 = vpop.f32.mrb[19].mxu0 }
 0x107   :  { %v1343_v19 = vpack.c.bf16 %v699_v7, %v698_v12  ;;  %v454_v20 = vadd.f32 %v1769_v8, %v453_v16  ;;  %v1841_v22 = vpack.c.bf16 %v745_v14, %v744_v17 }
 0x108   :  { %v701_v21 = vmax.f32 %v459_v15, 0.0 }
 0x109   :  { %v700_v24 = vmax.f32 %v454_v20, 0.0  ;;  %v1252_v26 = vpop.f32.mrb[20].mxu0  ;;  %1344 = vmatprep.subr.bf16.mxu1 %v1343_v19 }
 0x10a   :  { %v469_v27 = vadd.f32 %v1252_v26, %v1769_v8  ;;  %v463_v28 = vpop.f32.mrb[21].mxu0  ;;  %1346 = vmatpush3.bf16.msra.mxu1 %v1776_v25  ;;  %v746_v26 = vld [vmem:[%s1937_s3] sm:$0xff] }
 0x10b   :  { %v1347_v29 = vpack.c.bf16 %v701_v21, %v700_v24  ;;  %v464_v31 = vadd.f32 %v1769_v8, %v463_v28  ;;  %v749_v28 = vld [vmem:[%s1937_s3 + $0x18] sm:$0xff] }
 0x10c   :  { %v703_v32 = vmax.f32 %v469_v27, 0.0 }
 0x10d   :  { %v702_v33 = vmax.f32 %v464_v31, 0.0  ;;  %v1255_v35 = vpop.f32.mrb[22].mxu0  ;;  %1348 = vmatprep.subr.bf16.mxu1 %v1347_v29 }
 0x10e   :  { %v479_v36 = vadd.f32 %v1255_v35, %v1769_v8  ;;  %v473_v37 = vpop.f32.mrb[23].mxu0  ;;  %1350 = vmatpush3.bf16.msra.mxu1 %v1784_v39 }
 0x10f   :  { %v1351_v38 = vpack.c.bf16 %v703_v32, %v702_v33  ;;  %v474_v41 = vadd.f32 %v1769_v8, %v473_v37 }
 0x110   :  { %v705_v42 = vmax.f32 %v479_v36, 0.0 }
 0x111   :  { %v704_v43 = vmax.f32 %v474_v41, 0.0  ;;  %v1258_v45 = vpop.f32.mrb[24].mxu0  ;;  %1352 = vmatprep.subr.bf16.mxu1 %v1351_v38 }
 0x112   :  { %v489_v25 = vadd.f32 %v1258_v45, %v1769_v8  ;;  %v483_v46 = vpop.f32.mrb[25].mxu0  ;;  %1354 = vmatpush3.bf16.msra.mxu1 %v1792_v53 }
 0x113   :  { %v1355_v47 = vpack.c.bf16 %v705_v42, %v704_v43  ;;  %v484_v48 = vadd.f32 %v1769_v8, %v483_v46 }
 0x114   :  { %v707_v49 = vmax.f32 %v489_v25, 0.0 }
 0x115   :  { %v706_v51 = vmax.f32 %v484_v48, 0.0  ;;  %v1261_v52 = vpop.f32.mrb[26].mxu0  ;;  %1356 = vmatprep.subr.bf16.mxu1 %v1355_v47 }
 0x116   :  { %v499_v39 = vadd.f32 %v1261_v52, %v1769_v8  ;;  %v493_v54 = vpop.f32.mrb[27].mxu0  ;;  %1358 = vmatpush3.bf16.msra.mxu1 %v1800_v3 }
 0x117   :  { %v1359_v55 = vpack.c.bf16 %v707_v49, %v706_v51  ;;  %v494_v57 = vadd.f32 %v1769_v8, %v493_v54 }
 0x118   :  { %v709_v59 = vmax.f32 %v499_v39, 0.0 }
 0x119   :  { %v708_v60 = vmax.f32 %v494_v57, 0.0  ;;  %v1264_v61 = vpop.f32.mrb[28].mxu0  ;;  %1360 = vmatprep.subr.bf16.mxu1 %v1359_v55 }
 0x11a   :  { %v509_v53 = vadd.f32 %v1264_v61, %v1769_v8  ;;  %v503_v62 = vpop.f32.mrb[29].mxu0  ;;  %1362 = vmatpush3.bf16.msra.mxu1 %v1808_v18 }
 0x11b   :  { %v1363_v63 = vpack.c.bf16 %v709_v59, %v708_v60  ;;  %v504_v0 = vadd.f32 %v1769_v8, %v503_v62 }
 0x11c   :  { %v711_v1 = vmax.f32 %v509_v53, 0.0 }
 0x11d   :  { %v710_v4 = vmax.f32 %v504_v0, 0.0  ;;  %v1267_v5 = vpop.f32.mrb[30].mxu0  ;;  %1364 = vmatprep.subr.bf16.mxu1 %v1363_v63 }
 0x11e   :  { %v519_v3 = vadd.f32 %v1267_v5, %v1769_v8  ;;  %v513_v6 = vpop.f32.mrb[31].mxu0  ;;  %1366 = vmatpush3.bf16.msra.mxu1 %v1816_v34 }
 0x11f   :  { %v1367_v7 = vpack.c.bf16 %v711_v1, %v710_v4  ;;  %v514_v11 = vadd.f32 %v1769_v8, %v513_v6 }
 0x120   :  { %v713_v12 = vmax.f32 %v519_v3, 0.0  ;;  %v893_v3 = vld [vmem:[%s1938_s4 + $0x18] sm:$0xff] }
 0x121   :  { %v712_v13 = vmax.f32 %v514_v11, 0.0  ;;  %1368 = vmatprep.subr.bf16.mxu1 %v1367_v7  ;;  %v1270_v14 = vpop.f32.mrb[32].mxu0  ;;  %v894_v7 = vld [vmem:[%s1938_s4 + $0x20] sm:$0xff]  ;;  %v895_v11 = vld [vmem:[%s1938_s4 + $0x28] sm:$0xff] }
 0x122   :  { %v529_v18 = vadd.f32 %v1270_v14, %v1769_v8  ;;  %1370 = vmatpush3.bf16.msra.mxu1 %v1824_v50  ;;  %v523_v15 = vpop.f32.mrb[33].mxu0  ;;  %v897_v14 = vld [vmem:[%s1938_s4 + $0x38] sm:$0xff] }
 0x123   :  { %v1371_v16 = vpack.c.bf16 %v713_v12, %v712_v13  ;;  %v524_v17 = vadd.f32 %v1769_v8, %v523_v15  ;;  %v1414_v12 = vpack.c.bf16 %v895_v11, %v894_v7  ;;  %v896_v13 = vld [vmem:[%s1938_s4 + $0x30] sm:$0xff]  ;;  %v1455_v15 = vmov 0.0  }
 0x124   :  { %v715_v19 = vmax.f32 %v529_v18, 0.0  ;;  %v1417_v18 = vpack.c.bf16 %v897_v14, %v896_v13 }
 0x125   :  { %v714_v20 = vmax.f32 %v524_v17, 0.0  ;;  %1372 = vmatprep.subr.bf16.mxu1 %v1371_v16  ;;  %v1273_v21 = vpop.f32.mrb[34].mxu0 }
 0x126   :  { %v539_v34 = vadd.f32 %v1273_v21, %v1769_v8  ;;  %1374 = vmatpush3.bf16.msra.mxu1 %v1832_v2  ;;  %v533_v24 = vpop.f32.mrb[35].mxu0 }
 0x127   :  { %v1377_v27 = vpack.c.bf16 %v715_v19, %v714_v20  ;;  %v534_v50 = vadd.f32 %v1769_v8, %v533_v24  ;;  %1376 = vmatprep.subr.bf16.mxu1 %v1788_v44 }
 0x128   :  { %v717_v29 = vmax.f32 %v539_v34, 0.0 }
 0x129   :  { %v716_v31 = vmax.f32 %v534_v50, 0.0  ;;  %v1276_v32 = vpop.f32.mrb[36].mxu0  ;;  %815 = vmatmul.mubr.f32.vlgmr.msra.gmra.mrb[18].mxu1 %v746_v26  ;;  %v1060_v26 = vld [vmem:[%s1939_s5] ss:$0 sm:$0xff] }
 0x12a   :  { %v549_v2 = vadd.f32 %v1276_v32, %v1769_v8  ;;  %1378 = vmatpush3.bf16.msra.mxu1 %v1377_v27  ;;  %v543_v33 = vpop.f32.mrb[37].mxu0  ;;  %884 = vmatprep.mubr.f32.mxu1 %v749_v28 }
 0x12b   :  { %v1381_v35 = vpack.c.bf16 %v717_v29, %v716_v31  ;;  %v544_v36 = vadd.f32 %v1769_v8, %v543_v33  ;;  %1380 = vmatprep.subr.bf16.mxu1 %v1796_v58 }
 0x12c   :  { %v719_v37 = vmax.f32 %v549_v2, 0.0 }
 0x12d   :  { %v718_v44 = vmax.f32 %v544_v36, 0.0  ;;  %v1279_v38 = vpop.f32.mrb[38].mxu0 }
 0x12e   :  { %v559_v41 = vadd.f32 %v1279_v38, %v1769_v8  ;;  %1382 = vmatpush3.bf16.msra.mxu1 %v1381_v35  ;;  %v553_v42 = vpop.f32.mrb[39].mxu0 }
 0x12f   :  { %v1385_v43 = vpack.c.bf16 %v719_v37, %v718_v44  ;;  %v554_v45 = vadd.f32 %v1769_v8, %v553_v42  ;;  %1384 = vmatprep.subr.bf16.mxu1 %v1804_v9 }
 0x130   :  { %v721_v25 = vmax.f32 %v559_v41, 0.0 }
 0x131   :  { %v720_v46 = vmax.f32 %v554_v45, 0.0  ;;  %v1282_v47 = vpop.f32.mrb[40].mxu0 }
 0x132   :  { %v569_v48 = vadd.f32 %v1282_v47, %v1769_v8  ;;  %1386 = vmatpush3.bf16.msra.mxu1 %v1385_v43  ;;  %v563_v49 = vpop.f32.mrb[41].mxu0 }
 0x133   :  { %v1389_v58 = vpack.c.bf16 %v721_v25, %v720_v46  ;;  %v564_v51 = vadd.f32 %v1769_v8, %v563_v49  ;;  %1388 = vmatprep.subr.bf16.mxu1 %v1812_v23 }
 0x134   :  { %v723_v52 = vmax.f32 %v569_v48, 0.0 }
 0x135   :  { %v722_v39 = vmax.f32 %v564_v51, 0.0  ;;  %v1285_v54 = vpop.f32.mrb[42].mxu0 }
 0x136   :  { %v579_v55 = vadd.f32 %v1285_v54, %v1769_v8  ;;  %1390 = vmatpush3.bf16.msra.mxu1 %v1389_v58  ;;  %v573_v57 = vpop.f32.mrb[43].mxu0 }
 0x137   :  { %v1393_v9 = vpack.c.bf16 %v723_v52, %v722_v39  ;;  %v574_v59 = vadd.f32 %v1769_v8, %v573_v57  ;;  %1392 = vmatprep.subr.bf16.mxu1 %v1820_v40  ;;  %v748_v40 = vld [vmem:[%s1937_s3 + $0x10] sm:$0xff] }
 0x138   :  { %v725_v60 = vmax.f32 %v579_v55, 0.0 }
 0x139   :  { %v724_v61 = vmax.f32 %v574_v59, 0.0  ;;  %v1288_v53 = vpop.f32.mrb[44].mxu0 }
 0x13a   :  { %v589_v62 = vadd.f32 %v1288_v53, %v1769_v8  ;;  %1394 = vmatpush3.bf16.msra.mxu1 %v1393_v9  ;;  %v583_v63 = vpop.f32.mrb[45].mxu0 }
 0x13b   :  { %v1397_v23 = vpack.c.bf16 %v725_v60, %v724_v61  ;;  %v584_v0 = vadd.f32 %v1769_v8, %v583_v63  ;;  %1396 = vmatprep.subr.bf16.mxu1 %v1828_v56  ;;  %v890_v8 = vld [vmem:[%s1938_s4] sm:$0xff]  ;;  %v891_v56 = vld [vmem:[%s1938_s4 + $0x8] sm:$0xff] }
 0x13c   :  { %v727_v1 = vmax.f32 %v589_v62, 0.0 }
 0x13d   :  { %v726_v4 = vmax.f32 %v584_v0, 0.0 }
 0x13e   :  { %1398 = vmatpush3.bf16.msra.mxu1 %v1397_v23 }
 0x13f   :  { %v1401_v5 = vpack.c.bf16 %v727_v1, %v726_v4  ;;  %1400 = vmatprep.subr.bf16.mxu1 %v1836_v10  ;;  %v892_v10 = vld [vmem:[%s1938_s4 + $0x10] sm:$0xff]  ;;  %s986_s4 = sshll.u32 %s1456_s10, 4  ;;  %s987_s4 = int_to_ptr.vmem [resolvable:$true] %s986_s4 }
 0x140   :  { %v1411_v6 = vpack.c.bf16 %v893_v3, %v892_v10  ;;  %s1429_s11 = scalar_lea.vmem %s987_s4, 128  ;;  %p1434_p1 = scmp.lt.s32.totalorder %s987_s4, %s987_s4 }
 0x141   :  { %p1430_p0 = scmp.ne.s32.totalorder %s987_s4, %s1429_s11  ;;  %p1435_p2 = scmp.lt.s32.totalorder %s1429_s11, %s1429_s11 }
 0x142   :  { %1402 = vmatpush3.bf16.msra.mxu1 %v1401_v5 }
 0x143   :  { %1404 = vmatprep.subr.bf16.mxu1 %v1841_v22  ;;  %v1453_v22 = vmov 0.0|0.0   ;;  %p1436_p3 = por %p1435_p2, %p1434_p1 }
 0x145   :  { %p1437_p4 = pnand %p1436_p3, %p1430_p0 }
 0x146   :  { %1406 = vmatpush3.bf16.msra.mxu1 %v1780_v30  ;;  %v1408_v30 = vpack.c.bf16 %v891_v56, %v890_v8 }
 0x147   :  { %1407 = vmatprep.subr.bf16.mxu1 %v1453_v22 }
 0x149   :  { %885 = vmatmul.mubr.f32.vlgmr.msra.gmra.mrb[20].mxu1 %v748_v40 }
 0x14a   :  { %1409 = vmatpush3.bf16.msra.mxu1 %v1408_v30  ;;  %1332 = vmatprep.mubr.msk.f32.mxu1 %vm1454_vm2, %v1455_v15 }
 0x14b   :  { %1410 = vmatprep.subr.bf16.mxu1 %v1453_v22 }
 0x14e   :  { %1412 = vmatpush3.bf16.msra.mxu1 %v1411_v6 }
 0x14f   :  { %1413 = vmatprep.subr.bf16.mxu1 %v1453_v22 }
 0x152   :  { %1415 = vmatpush3.bf16.msra.mxu1 %v1414_v12 }
 0x153   :  { %1416 = vmatprep.subr.bf16.mxu1 %v1453_v22 }
 0x156   :  { %1418 = vmatpush3.bf16.msra.mxu1 %v1417_v18 }
 0x1fc   :  { %v1163_v16 = vpop.f32.mrb[18].mxu1 }
 0x1fd   :  { %v1164_v17 = vpop.f32.mrb[19].mxu1 }
 0x1fe   :  { %v1165_v19 = vadd.f32 %v1164_v17, %v1163_v16 }
 0x21c   :  { %v1198_v20 = vpop.f32.mrb[20].mxu1 }
 0x21d   :  { %v1199_v21 = vpop.f32.mrb[21].mxu1 }
 0x21e   :  { %v1200_v34 = vadd.f32 %v1199_v21, %v1198_v20 }
 0x220   :  { %v887_v24 = vadd.f32 %v1200_v34, %v1165_v19 }
 0x222   :  { %1333 = vmatmul.mubr.msk.f32.vlgmr.msra.gmra.mrb[22].mxu1 %vm905_vm3, %v887_v24 }
 0x2f5   :  { %v975_v27 = vpop.f32.mrb[22].mxu1 }
 0x2f6   :  { %v976_v50 = vadd.f32 %v1060_v26, %v975_v27  ;;  %v1334_v28 = vpop.f32.mrb[23].mxu1 }
 0x2f8   :  { %979 = vst [vmem:[#allocation2] sm:$0xff] %v976_v50 }
 0x2f9   :  { %1440 = shalt.err (!%p1437_p4)
}
 0x2fa   :  { %s1441_s0 = scalar_lea.hbm %s1940_s6, 128 }
 0x2fb   :  { %p1442_p5 = scmp.ne.s32.totalorder %s1940_s6, %s1441_s0  ;;  %p1445_p6 = scmp.lt.u32.totalorder %s1441_s0, %s1940_s6 }
 0x2fd   :  { %p1447_p7 = pnand %p1445_p6, %p1442_p5 }
 0x2ff   :  { %1450 = shalt.err (!%p1447_p7)
}
 0x300   :  { %989 = dma.vmem_to_hbm [thread:$0]  %s987_s4, 128, %s1940_s6, [#allocation3]  }
 0x301   :  { %1451 = dma.done.wait [#allocation3], 128  }
 0x302   :  { %1452 = vsyncadd [#allocation3], 4294967168 }
 0x303   :  { %993 = vsyncpa [#allocation3], 1 }

</bundles_post_ra>
